<compile_context>
chip_gen: v5e
topology: v5e:2x2
jax: 0.10.0
libtpu: 0.0.40
codegen_flags: <defaults>
</compile_context>

<pallas_src>
import jax
import jax.numpy as jnp
import numpy as np
from jax.experimental import pallas as pl
from jax.experimental.pallas import tpu as pltpu

# ---- model configuration (consistent with the module's __init__) --------------------------
N = 2            # batch
LATENT = 8       # latent_dim
S = 3            # conditional channels
T = 16           # sequence length
D1 = 10          # output_dim_1
C0 = S + 1       # conv input channels (latent row + condition channels) = 4
C1, C2 = 8, 16   # conv_output_channels
K_SZ = 3         # kernel_sizes (3, padding=1 preserves T)
H1, H2 = 32, 24  # linear_layers
BN_EPS = 1e-5

CMAX = 16        # lane width used for all conv-stage channels (= max(C0, C1, C2))
R = N * T        # 32 activation rows, n-major: row = n*T + t
TC2 = T * C2     # 256 flattened features
ST = S * T       # 48 flattened reconstructed-condition features
LANES = 128
OUT_R, OUT_W = 8, 128

assert (T & (T - 1)) == 0 and (CMAX & (CMAX - 1)) == 0
LOG2T = T.bit_length() - 1       # 4
LOG2C = CMAX.bit_length() - 1    # 4

# ---- packed parameter slab row offsets (all multiples of 8) -------------------------------
P_CONV1 = 0                      # (48, 16)  conv1 im2col weights   [rows k*CMAX + cin]
P_CONV2 = P_CONV1 + 3 * CMAX     # 48: (48, 16)  conv2 im2col weights
P_L1 = P_CONV2 + 3 * CMAX        # 96: (256, 80) [lin1 (lanes 0:32) | out-conv-as-dense (32:80)]
P_L2 = P_L1 + TC2                # 352: (32, 24)
P_LO = P_L2 + H1                 # 384: (24, 10)
P_VEC = P_LO + H2                # 408: bias / BN table (10 rows)
(V_C1B, V_BN1G, V_BN1B, V_C2B, V_BN2G, V_BN2B,
 V_L1B, V_L2B, V_LOB, V_RCB) = range(P_VEC, P_VEC + 10)
P_ROWS = P_VEC + 16              # 424 total rows (padded to a sublane multiple)


# ---------------------------------- Pallas kernel ------------------------------------------
def _cnn_decoder_kernel(z_ref, cond_ref, p_ref, out_ref):
    f32 = jnp.float32

    def iota(shape, dim):
        return jax.lax.broadcasted_iota(jnp.int32, shape, dim)

    # ---- hoisted index masks (static iota / compare / bit ops, built once per call) -------
    t_row = iota((R, CMAX), 0) & (T - 1)                      # timestep of each activation row
    mask_prev = (t_row != 0).astype(f32)                      # zero the t==0 rows of the -1 tap
    mask_next = (t_row != (T - 1)).astype(f32)                # zero the t==T-1 rows of the +1 tap

    # ---- assemble combined_input (R, CMAX), rows n-major (row = n*T + t) ------------------
    # X[n, c*T + t] = [z_padded | cond_0 | cond_1 | cond_2]
    zp = jnp.concatenate([z_ref[...], jnp.zeros((N, T - LATENT), f32)], axis=1)       # (N, T)
    x_nq = jnp.concatenate([zp] + [cond_ref[:, s, :] for s in range(S)], axis=1)      # (N, C0*T)
    # replicate each sample's row over its T activation rows (tiny MXU selection matmul)
    a_sel = (iota((R, N), 1) == (iota((R, N), 0) >> LOG2T)).astype(f32)               # (R, N)
    x_rq = jnp.dot(a_sel, x_nq, preferred_element_type=f32)                           # (R, C0*T)
    # pick, per row, the value at that row's timestep in each channel group
    pick = ((iota((R, C0 * T), 1) & (T - 1)) ==
            (iota((R, C0 * T), 0) & (T - 1))).astype(f32)                             # (R, C0*T)
    csel = ((iota((C0 * T, CMAX), 0) >> LOG2T) == iota((C0 * T, CMAX), 1)).astype(f32)
    comb = jnp.dot(x_rq * pick, csel, preferred_element_type=f32)                     # (R, CMAX)

    def conv3(x, w_row, b_row):
        # Conv1d (K=3, stride=1, padding=1) as ONE im2col matmul; +-1 time taps come from
        # XLU sublane rolls + boundary masks (rows are n-major so the shift is +-1 row).
        prev = pltpu.roll(x, shift=1, axis=0) * mask_prev
        nxt = pltpu.roll(x, shift=R - 1, axis=0) * mask_next
        cols = jnp.concatenate([prev, x, nxt], axis=1)                                # (R, 3*CMAX)
        w = p_ref[w_row:w_row + 3 * CMAX, 0:CMAX]                                     # (3*CMAX, CMAX)
        b = p_ref[b_row:b_row + 1, 0:CMAX]                                            # (1, CMAX)
        return jnp.dot(cols, w, preferred_element_type=f32) + b

    def bn_relu(x, g_row, be_row):
        # training-mode BatchNorm1d (biased variance); single fused sum / sum-of-squares
        # reduction, fused ReLU.  Padded channels have gamma == 0 and stay exactly zero.
        g = p_ref[g_row:g_row + 1, 0:CMAX]
        be = p_ref[be_row:be_row + 1, 0:CMAX]
        stats = jnp.sum(jnp.concatenate([x, x * x], axis=1),
                        axis=0, keepdims=True) * (1.0 / R)                            # (1, 2*CMAX)
        mean = stats[:, 0:CMAX]
        ex2 = stats[:, CMAX:2 * CMAX]
        scale = g * jax.lax.rsqrt(ex2 - mean * mean + BN_EPS)
        return jnp.maximum(x * scale + (be - mean * scale), 0.0)

    # convolutional_sequence: (Conv1d -> BatchNorm1d -> ReLU) x 2
    h = bn_relu(conv3(comb, P_CONV1, V_C1B), V_BN1G, V_BN1B)                          # (R, CMAX)
    h = bn_relu(conv3(h, P_CONV2, V_C2B), V_BN2G, V_BN2B)                             # (R, CMAX)

    # flatten (R, CMAX) -> (N, T*CMAX) without any reshape: expand along lanes with an MXU
    # matmul, mask to the row's timestep slot, then sum each sample's T rows.
    e_rep = ((iota((CMAX, TC2), 1) & (CMAX - 1)) == iota((CMAX, TC2), 0)).astype(f32)  # (CMAX, TC2)
    m_flat = ((iota((R, TC2), 1) >> LOG2C) == (iota((R, TC2), 0) & (T - 1))).astype(f32)
    n_sel = ((iota((N, R), 1) >> LOG2T) == iota((N, R), 0)).astype(f32)                # (N, R)
    hf = jnp.dot(n_sel,
                 jnp.dot(h, e_rep, preferred_element_type=f32) * m_flat,
                 preferred_element_type=f32)                                           # (N, TC2)

    # first linear layer and output_layer_conv (as a banded dense matrix) share one matmul
    yz = jnp.dot(hf, p_ref[P_L1:P_L1 + TC2, 0:H1 + ST], preferred_element_type=f32)    # (N, H1+ST)
    y = jnp.maximum(yz[:, 0:H1] + p_ref[V_L1B:V_L1B + 1, 0:H1], 0.0)
    rc = yz[:, H1:H1 + ST] + p_ref[V_RCB:V_RCB + 1, 0:ST]                              # (N, S*T)

    # remaining decoder_linear_layers + output_layer_linear
    y = jnp.maximum(jnp.dot(y, p_ref[P_L2:P_L2 + H1, 0:H2], preferred_element_type=f32)
                    + p_ref[V_L2B:V_L2B + 1, 0:H2], 0.0)
    rx = (jnp.dot(y, p_ref[P_LO:P_LO + H2, 0:D1], preferred_element_type=f32)
          + p_ref[V_LOB:V_LOB + 1, 0:D1])                                              # (N, D1)

    # single lane-dense (8, 128) output slab: [rx | rc | zero pad]
    row = jnp.concatenate([rx, rc, jnp.zeros((N, OUT_W - D1 - ST), f32)], axis=1)      # (N, OUT_W)
    out_ref[...] = jnp.concatenate([row, jnp.zeros((OUT_R - N, OUT_W), f32)], axis=0)  # (8, 128)


# -------------------------- one-time parameter re-layout (hoisted) --------------------------
def prepare_params(p):
    """Pack PyTorch-style parameters ONCE into a single kernel-ready (P_ROWS, 128) slab."""
    def _np(a):
        return np.asarray(a, np.float32)

    def conv_block(w):                       # (cout, cin, K) -> (K*CMAX, CMAX) im2col weight
        w = _np(w)
        cout, cin, k = w.shape
        blk = np.zeros((k, CMAX, CMAX), np.float32)
        blk[:, :cin, :cout] = np.transpose(w, (2, 1, 0))
        return blk.reshape(k * CMAX, CMAX)   # rows: k*CMAX + cin

    slab = np.zeros((P_ROWS, LANES), np.float32)
    slab[P_CONV1:P_CONV1 + 3 * CMAX, :CMAX] = conv_block(p['conv1_w'])
    slab[P_CONV2:P_CONV2 + 3 * CMAX, :CMAX] = conv_block(p['conv2_w'])

    # lin1: PyTorch flatten order (c*T + t) re-folded to the kernel's hf order (t*CMAX + c)
    wl1 = np.transpose(_np(p['lin1_w']).reshape(H1, C2, T), (2, 1, 0)).reshape(TC2, H1)
    slab[P_L1:P_L1 + TC2, 0:H1] = wl1

    # output_layer_conv as a banded dense matrix acting on the flattened features,
    # producing reconstructed_condition directly in (s*T + t) order
    w_oc = _np(p['out_conv_w'])              # (S, C2, K)
    wbig = np.zeros((TC2, ST), np.float32)
    for s in range(S):
        for t in range(T):
            for k in range(K_SZ):
                tp = t + k - 1
                if 0 <= tp < T:
                    wbig[tp * CMAX:tp * CMAX + C2, s * T + t] = w_oc[s, :, k]
    slab[P_L1:P_L1 + TC2, H1:H1 + ST] = wbig

    slab[P_L2:P_L2 + H1, :H2] = _np(p['lin2_w']).T
    slab[P_LO:P_LO + H2, :D1] = _np(p['out_lin_w']).T

    for row, val in ((V_C1B, p['conv1_b']), (V_BN1G, p['bn1_g']), (V_BN1B, p['bn1_b']),
                     (V_C2B, p['conv2_b']), (V_BN2G, p['bn2_g']), (V_BN2B, p['bn2_b']),
                     (V_L1B, p['lin1_b']), (V_L2B, p['lin2_b']), (V_LOB, p['out_lin_b'])):
        v = _np(val)
        slab[row, :v.shape[0]] = v
    slab[V_RCB, :ST] = np.repeat(_np(p['out_conv_b']), T)   # bias replicated per timestep
    return jnp.asarray(slab)


# ---------------------------------- wrapper -------------------------------------------------
def cnn_decoder_pallas(z, cond, packed_params):
    out = pl.pallas_call(
        _cnn_decoder_kernel,
        out_shape=jax.ShapeDtypeStruct((OUT_R, OUT_W), jnp.float32),
        in_specs=[pl.BlockSpec(memory_space=pltpu.MemorySpace.VMEM)] * 3,
        out_specs=pl.BlockSpec(memory_space=pltpu.MemorySpace.VMEM),
        cost_estimate=pl.CostEstimate(flops=550_000, transcendentals=64,
                                      bytes_accessed=230_000),
    )(z.astype(jnp.float32), cond.astype(jnp.float32), packed_params)
    rx = out[0:N, 0:D1]
    rc = out[0:N, D1:D1 + ST].reshape(N, S, T)   # rows of rc are already (s*T + t) ordered
    return rx, rc


# ------------------------------ pure-JAX reference (NCT, mirrors PyTorch) -------------------
def cnn_decoder_reference(z, cond, p):
    z_pad = jnp.pad(z[:, None, :], ((0, 0), (0, 0), (0, T - LATENT)))
    x = jnp.concatenate([z_pad, cond], axis=1)                                  # (N, C0, T)

    def conv1d(x, w, b):
        xp = jnp.pad(x, ((0, 0), (0, 0), (1, 1)))
        out = sum(jnp.einsum('nct,oc->not', xp[:, :, k:k + T], w[:, :, k])
                  for k in range(w.shape[2]))
        return out + b[None, :, None]

    def bn(x, g, be):
        m = jnp.mean(x, axis=(0, 2), keepdims=True)
        v = jnp.mean((x - m) ** 2, axis=(0, 2), keepdims=True)
        return (x - m) / jnp.sqrt(v + BN_EPS) * g[None, :, None] + be[None, :, None]

    h = jnp.maximum(bn(conv1d(x, p['conv1_w'], p['conv1_b']), p['bn1_g'], p['bn1_b']), 0.0)
    h = jnp.maximum(bn(conv1d(h, p['conv2_w'], p['conv2_b']), p['bn2_g'], p['bn2_b']), 0.0)
    hf = h.reshape(h.shape[0], -1)
    y = jnp.maximum(hf @ p['lin1_w'].T + p['lin1_b'], 0.0)
    y = jnp.maximum(y @ p['lin2_w'].T + p['lin2_b'], 0.0)
    rx = y @ p['out_lin_w'].T + p['out_lin_b']
    rc = conv1d(h, p['out_conv_w'], p['out_conv_b'])
    return rx, rc


# ------------------------------ deterministic parameter init --------------------------------
def init_params(key):
    ks = jax.random.split(key, 16)

    def w(k, shape, scale=0.1):
        return (scale * jax.random.normal(k, shape)).astype(jnp.float32)

    return dict(
        conv1_w=w(ks[0], (C1, C0, K_SZ)), conv1_b=w(ks[1], (C1,)),
        bn1_g=(jnp.ones((C1,), jnp.float32) + w(ks[2], (C1,))), bn1_b=w(ks[3], (C1,)),
        conv2_w=w(ks[4], (C2, C1, K_SZ)), conv2_b=w(ks[5], (C2,)),
        bn2_g=(jnp.ones((C2,), jnp.float32) + w(ks[6], (C2,))), bn2_b=w(ks[7], (C2,)),
        lin1_w=w(ks[8], (H1, C2 * T)), lin1_b=w(ks[9], (H1,)),
        lin2_w=w(ks[10], (H2, H1)), lin2_b=w(ks[11], (H2,)),
        out_lin_w=w(ks[12], (D1, H2)), out_lin_b=w(ks[13], (D1,)),
        out_conv_w=w(ks[14], (S, C2, K_SZ)), out_conv_b=w(ks[15], (S,)),
    )


if __name__ == "__main__":
    key = jax.random.PRNGKey(0)
    kz, kc, kp = jax.random.split(key, 3)
    z = jax.random.normal(kz, (N, LATENT), dtype=jnp.float32)
    cond = jax.random.normal(kc, (N, S, T), dtype=jnp.float32)
    params = init_params(kp)

    packed = prepare_params(params)          # one-time re-layout (hoisted out of the call)

    fwd = jax.jit(cnn_decoder_pallas)
    rx, rc = fwd(z, cond, packed)
    jax.block_until_ready((rx, rc))

    assert rx.shape == (N, D1), rx.shape
    assert rc.shape == (N, S, T), rc.shape

    rx_ref, rc_ref = cnn_decoder_reference(z, cond, params)
    # loose tolerance: MXU matmul precision differs slightly from the XLA reference path
    assert jnp.allclose(rx, rx_ref, atol=5e-2, rtol=5e-2)
    assert jnp.allclose(rc, rc_ref, atol=5e-2, rtol=5e-2)

    print("KERNEL_OK")
</pallas_src>

<mosaic_0001>
module attributes {stable_mosaic.version = 11 : i64} {
  func.func @_cnn_decoder_kernel(%arg0: memref<2x8xf32, #tpu.memory_space<vmem>>, %arg1: memref<2x3x16xf32, #tpu.memory_space<vmem>>, %arg2: memref<424x128xf32, #tpu.memory_space<vmem>>, %arg3: memref<8x128xf32, #tpu.memory_space<vmem>>) attributes {dimension_semantics = [], scalar_prefetch = 0 : i64, scratch_operands = 0 : i64, tpu.core_type = #tpu.core_type<tc>} {
    %0 = tpu.iota {dimensions = array<i32: 0>} : vector<32x16xi32>
    %c15_i32 = arith.constant 15 : i32
    %1 = vector.broadcast %c15_i32 : i32 to vector<32x16xi32>
    %2 = arith.andi %0, %1 : vector<32x16xi32>
    %c0_i32 = arith.constant 0 : i32
    %3 = vector.broadcast %c0_i32 : i32 to vector<32x16xi32>
    %4 = arith.cmpi ne, %2, %3 : vector<32x16xi32>
    %5 = arith.extui %4 : vector<32x16xi1> to vector<32x16xi32>
    %6 = arith.sitofp %5 : vector<32x16xi32> to vector<32x16xf32>
    %c15_i32_0 = arith.constant 15 : i32
    %7 = vector.broadcast %c15_i32_0 : i32 to vector<32x16xi32>
    %8 = arith.cmpi ne, %2, %7 : vector<32x16xi32>
    %9 = arith.extui %8 : vector<32x16xi1> to vector<32x16xi32>
    %10 = arith.sitofp %9 : vector<32x16xi32> to vector<32x16xf32>
    %c0 = arith.constant 0 : index
    %c0_1 = arith.constant 0 : index
    %11 = vector.load %arg0[%c0, %c0_1] : memref<2x8xf32, #tpu.memory_space<vmem>>, vector<2x8xf32>
    %cst = arith.constant 0.000000e+00 : f32
    %12 = vector.broadcast %cst : f32 to vector<2x8xf32>
    %13 = tpu.concatenate %11, %12 in 1 : vector<2x8xf32>, vector<2x8xf32> -> vector<2x16xf32>
    %c0_2 = arith.constant 0 : index
    %c0_3 = arith.constant 0 : index
    %c0_4 = arith.constant 0 : index
    %14 = vector.load %arg1[%c0_2, %c0_3, %c0_4] : memref<2x3x16xf32, #tpu.memory_space<vmem>>, vector<2x1x16xf32>
    %15 = vector.shape_cast %14 : vector<2x1x16xf32> to vector<2x16xf32>
    %c0_5 = arith.constant 0 : index
    %c1 = arith.constant 1 : index
    %c0_6 = arith.constant 0 : index
    %16 = vector.load %arg1[%c0_5, %c1, %c0_6] : memref<2x3x16xf32, #tpu.memory_space<vmem>>, vector<2x1x16xf32>
    %17 = vector.shape_cast %16 : vector<2x1x16xf32> to vector<2x16xf32>
    %c0_7 = arith.constant 0 : index
    %c2 = arith.constant 2 : index
    %c0_8 = arith.constant 0 : index
    %18 = vector.load %arg1[%c0_7, %c2, %c0_8] : memref<2x3x16xf32, #tpu.memory_space<vmem>>, vector<2x1x16xf32>
    %19 = vector.shape_cast %18 : vector<2x1x16xf32> to vector<2x16xf32>
    %20 = tpu.concatenate %13, %15, %17, %19 in 1 : vector<2x16xf32>, vector<2x16xf32>, vector<2x16xf32>, vector<2x16xf32> -> vector<2x64xf32>
    %21 = tpu.iota {dimensions = array<i32: 1>} : vector<32x2xi32>
    %22 = tpu.iota {dimensions = array<i32: 0>} : vector<32x2xi32>
    %c4_i32 = arith.constant 4 : i32
    %23 = vector.broadcast %c4_i32 : i32 to vector<32x2xi32>
    %24 = arith.shrsi %22, %23 : vector<32x2xi32>
    %25 = arith.cmpi eq, %21, %24 : vector<32x2xi32>
    %26 = arith.extui %25 : vector<32x2xi1> to vector<32x2xi32>
    %27 = arith.sitofp %26 : vector<32x2xi32> to vector<32x2xf32>
    %cst_9 = arith.constant dense<0.000000e+00> : vector<32x64xf32>
    %28 = tpu.matmul %27, %20, %cst_9 {dimension_numbers = #tpu.dot_dimension_numbers<[1], [0], [0], [1], [0, 0, 1, 1], [], []>} : vector<32x2xf32>, vector<2x64xf32>, vector<32x64xf32> -> vector<32x64xf32>
    %29 = tpu.iota {dimensions = array<i32: 1>} : vector<32x64xi32>
    %c15_i32_10 = arith.constant 15 : i32
    %30 = vector.broadcast %c15_i32_10 : i32 to vector<32x64xi32>
    %31 = arith.andi %29, %30 : vector<32x64xi32>
    %32 = tpu.iota {dimensions = array<i32: 0>} : vector<32x64xi32>
    %c15_i32_11 = arith.constant 15 : i32
    %33 = vector.broadcast %c15_i32_11 : i32 to vector<32x64xi32>
    %34 = arith.andi %32, %33 : vector<32x64xi32>
    %35 = arith.cmpi eq, %31, %34 : vector<32x64xi32>
    %36 = arith.extui %35 : vector<32x64xi1> to vector<32x64xi32>
    %37 = arith.sitofp %36 : vector<32x64xi32> to vector<32x64xf32>
    %38 = tpu.iota {dimensions = array<i32: 0>} : vector<64x16xi32>
    %c4_i32_12 = arith.constant 4 : i32
    %39 = vector.broadcast %c4_i32_12 : i32 to vector<64x16xi32>
    %40 = arith.shrsi %38, %39 : vector<64x16xi32>
    %41 = tpu.iota {dimensions = array<i32: 1>} : vector<64x16xi32>
    %42 = arith.cmpi eq, %40, %41 : vector<64x16xi32>
    %43 = arith.extui %42 : vector<64x16xi1> to vector<64x16xi32>
    %44 = arith.sitofp %43 : vector<64x16xi32> to vector<64x16xf32>
    %45 = arith.mulf %28, %37 : vector<32x64xf32>
    %cst_13 = arith.constant dense<0.000000e+00> : vector<32x16xf32>
    %46 = tpu.matmul %45, %44, %cst_13 {dimension_numbers = #tpu.dot_dimension_numbers<[1], [0], [0], [1], [0, 0, 1, 1], [], []>} : vector<32x64xf32>, vector<64x16xf32>, vector<32x16xf32> -> vector<32x16xf32>
    %c1_i32 = arith.constant 1 : i32
    %47 = tpu.dynamic_rotate %46 by %c1_i32 dim 0 : vector<32x16xf32>, i32 -> vector<32x16xf32>
    %48 = arith.mulf %47, %6 : vector<32x16xf32>
    %c31_i32 = arith.constant 31 : i32
    %49 = tpu.dynamic_rotate %46 by %c31_i32 dim 0 : vector<32x16xf32>, i32 -> vector<32x16xf32>
    %50 = arith.mulf %49, %10 : vector<32x16xf32>
    %51 = tpu.concatenate %48, %46, %50 in 1 : vector<32x16xf32>, vector<32x16xf32>, vector<32x16xf32> -> vector<32x48xf32>
    %c0_14 = arith.constant 0 : index
    %c0_15 = arith.constant 0 : index
    %52 = vector.load %arg2[%c0_14, %c0_15] : memref<424x128xf32, #tpu.memory_space<vmem>>, vector<48x16xf32>
    %c408 = arith.constant 408 : index
    %c0_16 = arith.constant 0 : index
    %53 = vector.load %arg2[%c408, %c0_16] : memref<424x128xf32, #tpu.memory_space<vmem>>, vector<1x16xf32>
    %cst_17 = arith.constant dense<0.000000e+00> : vector<32x16xf32>
    %54 = tpu.matmul %51, %52, %cst_17 {dimension_numbers = #tpu.dot_dimension_numbers<[1], [0], [0], [1], [0, 0, 1, 1], [], []>} : vector<32x48xf32>, vector<48x16xf32>, vector<32x16xf32> -> vector<32x16xf32>
    %55 = vector.broadcast %53 : vector<1x16xf32> to vector<32x16xf32>
    %56 = arith.addf %54, %55 : vector<32x16xf32>
    %c409 = arith.constant 409 : index
    %c0_18 = arith.constant 0 : index
    %57 = vector.load %arg2[%c409, %c0_18] : memref<424x128xf32, #tpu.memory_space<vmem>>, vector<1x16xf32>
    %c410 = arith.constant 410 : index
    %c0_19 = arith.constant 0 : index
    %58 = vector.load %arg2[%c410, %c0_19] : memref<424x128xf32, #tpu.memory_space<vmem>>, vector<1x16xf32>
    %59 = arith.mulf %56, %56 : vector<32x16xf32>
    %60 = tpu.concatenate %56, %59 in 1 : vector<32x16xf32>, vector<32x16xf32> -> vector<32x32xf32>
    %cst_20 = arith.constant dense<0.000000e+00> : vector<32xf32>
    %61 = vector.multi_reduction <add>, %60, %cst_20 [0] : vector<32x32xf32> to vector<32xf32>
    %62 = vector.shape_cast %61 : vector<32xf32> to vector<1x32xf32>
    %cst_21 = arith.constant 3.125000e-02 : f32
    %63 = vector.broadcast %cst_21 : f32 to vector<1x32xf32>
    %64 = arith.mulf %62, %63 : vector<1x32xf32>
    %65 = vector.extract_strided_slice %64 {offsets = [0, 0], sizes = [1, 16], strides = [1, 1]} : vector<1x32xf32> to vector<1x16xf32>
    %66 = vector.extract_strided_slice %64 {offsets = [0, 16], sizes = [1, 16], strides = [1, 1]} : vector<1x32xf32> to vector<1x16xf32>
    %67 = arith.mulf %65, %65 : vector<1x16xf32>
    %68 = arith.subf %66, %67 : vector<1x16xf32>
    %cst_22 = arith.constant 9.99999974E-6 : f32
    %69 = vector.broadcast %cst_22 : f32 to vector<1x16xf32>
    %70 = arith.addf %68, %69 : vector<1x16xf32>
    %71 = math.rsqrt %70 : vector<1x16xf32>
    %72 = arith.mulf %57, %71 : vector<1x16xf32>
    %73 = vector.broadcast %72 : vector<1x16xf32> to vector<32x16xf32>
    %74 = arith.mulf %56, %73 : vector<32x16xf32>
    %75 = arith.mulf %65, %72 : vector<1x16xf32>
    %76 = arith.subf %58, %75 : vector<1x16xf32>
    %77 = vector.broadcast %76 : vector<1x16xf32> to vector<32x16xf32>
    %78 = arith.addf %74, %77 : vector<32x16xf32>
    %cst_23 = arith.constant 0.000000e+00 : f32
    %79 = vector.broadcast %cst_23 : f32 to vector<32x16xf32>
    %80 = arith.maximumf %78, %79 : vector<32x16xf32>
    %c1_i32_24 = arith.constant 1 : i32
    %81 = tpu.dynamic_rotate %80 by %c1_i32_24 dim 0 : vector<32x16xf32>, i32 -> vector<32x16xf32>
    %82 = arith.mulf %81, %6 : vector<32x16xf32>
    %c31_i32_25 = arith.constant 31 : i32
    %83 = tpu.dynamic_rotate %80 by %c31_i32_25 dim 0 : vector<32x16xf32>, i32 -> vector<32x16xf32>
    %84 = arith.mulf %83, %10 : vector<32x16xf32>
    %85 = tpu.concatenate %82, %80, %84 in 1 : vector<32x16xf32>, vector<32x16xf32>, vector<32x16xf32> -> vector<32x48xf32>
    %c48 = arith.constant 48 : index
    %c0_26 = arith.constant 0 : index
    %86 = vector.load %arg2[%c48, %c0_26] : memref<424x128xf32, #tpu.memory_space<vmem>>, vector<48x16xf32>
    %c411 = arith.constant 411 : index
    %c0_27 = arith.constant 0 : index
    %87 = vector.load %arg2[%c411, %c0_27] : memref<424x128xf32, #tpu.memory_space<vmem>>, vector<1x16xf32>
    %cst_28 = arith.constant dense<0.000000e+00> : vector<32x16xf32>
    %88 = tpu.matmul %85, %86, %cst_28 {dimension_numbers = #tpu.dot_dimension_numbers<[1], [0], [0], [1], [0, 0, 1, 1], [], []>} : vector<32x48xf32>, vector<48x16xf32>, vector<32x16xf32> -> vector<32x16xf32>
    %89 = vector.broadcast %87 : vector<1x16xf32> to vector<32x16xf32>
    %90 = arith.addf %88, %89 : vector<32x16xf32>
    %c412 = arith.constant 412 : index
    %c0_29 = arith.constant 0 : index
    %91 = vector.load %arg2[%c412, %c0_29] : memref<424x128xf32, #tpu.memory_space<vmem>>, vector<1x16xf32>
    %c413 = arith.constant 413 : index
    %c0_30 = arith.constant 0 : index
    %92 = vector.load %arg2[%c413, %c0_30] : memref<424x128xf32, #tpu.memory_space<vmem>>, vector<1x16xf32>
    %93 = arith.mulf %90, %90 : vector<32x16xf32>
    %94 = tpu.concatenate %90, %93 in 1 : vector<32x16xf32>, vector<32x16xf32> -> vector<32x32xf32>
    %cst_31 = arith.constant dense<0.000000e+00> : vector<32xf32>
    %95 = vector.multi_reduction <add>, %94, %cst_31 [0] : vector<32x32xf32> to vector<32xf32>
    %96 = vector.shape_cast %95 : vector<32xf32> to vector<1x32xf32>
    %cst_32 = arith.constant 3.125000e-02 : f32
    %97 = vector.broadcast %cst_32 : f32 to vector<1x32xf32>
    %98 = arith.mulf %96, %97 : vector<1x32xf32>
    %99 = vector.extract_strided_slice %98 {offsets = [0, 0], sizes = [1, 16], strides = [1, 1]} : vector<1x32xf32> to vector<1x16xf32>
    %100 = vector.extract_strided_slice %98 {offsets = [0, 16], sizes = [1, 16], strides = [1, 1]} : vector<1x32xf32> to vector<1x16xf32>
    %101 = arith.mulf %99, %99 : vector<1x16xf32>
    %102 = arith.subf %100, %101 : vector<1x16xf32>
    %cst_33 = arith.constant 9.99999974E-6 : f32
    %103 = vector.broadcast %cst_33 : f32 to vector<1x16xf32>
    %104 = arith.addf %102, %103 : vector<1x16xf32>
    %105 = math.rsqrt %104 : vector<1x16xf32>
    %106 = arith.mulf %91, %105 : vector<1x16xf32>
    %107 = vector.broadcast %106 : vector<1x16xf32> to vector<32x16xf32>
    %108 = arith.mulf %90, %107 : vector<32x16xf32>
    %109 = arith.mulf %99, %106 : vector<1x16xf32>
    %110 = arith.subf %92, %109 : vector<1x16xf32>
    %111 = vector.broadcast %110 : vector<1x16xf32> to vector<32x16xf32>
    %112 = arith.addf %108, %111 : vector<32x16xf32>
    %cst_34 = arith.constant 0.000000e+00 : f32
    %113 = vector.broadcast %cst_34 : f32 to vector<32x16xf32>
    %114 = arith.maximumf %112, %113 : vector<32x16xf32>
    %115 = tpu.iota {dimensions = array<i32: 1>} : vector<16x256xi32>
    %c15_i32_35 = arith.constant 15 : i32
    %116 = vector.broadcast %c15_i32_35 : i32 to vector<16x256xi32>
    %117 = arith.andi %115, %116 : vector<16x256xi32>
    %118 = tpu.iota {dimensions = array<i32: 0>} : vector<16x256xi32>
    %119 = arith.cmpi eq, %117, %118 : vector<16x256xi32>
    %120 = arith.extui %119 : vector<16x256xi1> to vector<16x256xi32>
    %121 = arith.sitofp %120 : vector<16x256xi32> to vector<16x256xf32>
    %122 = tpu.iota {dimensions = array<i32: 1>} : vector<32x256xi32>
    %c4_i32_36 = arith.constant 4 : i32
    %123 = vector.broadcast %c4_i32_36 : i32 to vector<32x256xi32>
    %124 = arith.shrsi %122, %123 : vector<32x256xi32>
    %125 = tpu.iota {dimensions = array<i32: 0>} : vector<32x256xi32>
    %c15_i32_37 = arith.constant 15 : i32
    %126 = vector.broadcast %c15_i32_37 : i32 to vector<32x256xi32>
    %127 = arith.andi %125, %126 : vector<32x256xi32>
    %128 = arith.cmpi eq, %124, %127 : vector<32x256xi32>
    %129 = arith.extui %128 : vector<32x256xi1> to vector<32x256xi32>
    %130 = arith.sitofp %129 : vector<32x256xi32> to vector<32x256xf32>
    %131 = tpu.iota {dimensions = array<i32: 1>} : vector<2x32xi32>
    %c4_i32_38 = arith.constant 4 : i32
    %132 = vector.broadcast %c4_i32_38 : i32 to vector<2x32xi32>
    %133 = arith.shrsi %131, %132 : vector<2x32xi32>
    %134 = tpu.iota {dimensions = array<i32: 0>} : vector<2x32xi32>
    %135 = arith.cmpi eq, %133, %134 : vector<2x32xi32>
    %136 = arith.extui %135 : vector<2x32xi1> to vector<2x32xi32>
    %137 = arith.sitofp %136 : vector<2x32xi32> to vector<2x32xf32>
    %cst_39 = arith.constant dense<0.000000e+00> : vector<32x256xf32>
    %138 = tpu.matmul %114, %121, %cst_39 {dimension_numbers = #tpu.dot_dimension_numbers<[1], [0], [0], [1], [0, 0, 1, 1], [], []>} : vector<32x16xf32>, vector<16x256xf32>, vector<32x256xf32> -> vector<32x256xf32>
    %139 = arith.mulf %138, %130 : vector<32x256xf32>
    %cst_40 = arith.constant dense<0.000000e+00> : vector<2x256xf32>
    %140 = tpu.matmul %137, %139, %cst_40 {dimension_numbers = #tpu.dot_dimension_numbers<[1], [0], [0], [1], [0, 0, 1, 1], [], []>} : vector<2x32xf32>, vector<32x256xf32>, vector<2x256xf32> -> vector<2x256xf32>
    %c96 = arith.constant 96 : index
    %c0_41 = arith.constant 0 : index
    %141 = vector.load %arg2[%c96, %c0_41] : memref<424x128xf32, #tpu.memory_space<vmem>>, vector<256x80xf32>
    %cst_42 = arith.constant dense<0.000000e+00> : vector<2x80xf32>
    %142 = tpu.matmul %140, %141, %cst_42 {dimension_numbers = #tpu.dot_dimension_numbers<[1], [0], [0], [1], [0, 0, 1, 1], [], []>} : vector<2x256xf32>, vector<256x80xf32>, vector<2x80xf32> -> vector<2x80xf32>
    %143 = vector.extract_strided_slice %142 {offsets = [0, 0], sizes = [2, 32], strides = [1, 1]} : vector<2x80xf32> to vector<2x32xf32>
    %c414 = arith.constant 414 : index
    %c0_43 = arith.constant 0 : index
    %144 = vector.load %arg2[%c414, %c0_43] : memref<424x128xf32, #tpu.memory_space<vmem>>, vector<1x32xf32>
    %145 = vector.broadcast %144 : vector<1x32xf32> to vector<2x32xf32>
    %146 = arith.addf %143, %145 : vector<2x32xf32>
    %cst_44 = arith.constant 0.000000e+00 : f32
    %147 = vector.broadcast %cst_44 : f32 to vector<2x32xf32>
    %148 = arith.maximumf %146, %147 : vector<2x32xf32>
    %149 = vector.extract_strided_slice %142 {offsets = [0, 32], sizes = [2, 48], strides = [1, 1]} : vector<2x80xf32> to vector<2x48xf32>
    %c417 = arith.constant 417 : index
    %c0_45 = arith.constant 0 : index
    %150 = vector.load %arg2[%c417, %c0_45] : memref<424x128xf32, #tpu.memory_space<vmem>>, vector<1x48xf32>
    %151 = vector.broadcast %150 : vector<1x48xf32> to vector<2x48xf32>
    %152 = arith.addf %149, %151 : vector<2x48xf32>
    %c352 = arith.constant 352 : index
    %c0_46 = arith.constant 0 : index
    %153 = vector.load %arg2[%c352, %c0_46] : memref<424x128xf32, #tpu.memory_space<vmem>>, vector<32x24xf32>
    %cst_47 = arith.constant dense<0.000000e+00> : vector<2x24xf32>
    %154 = tpu.matmul %148, %153, %cst_47 {dimension_numbers = #tpu.dot_dimension_numbers<[1], [0], [0], [1], [0, 0, 1, 1], [], []>} : vector<2x32xf32>, vector<32x24xf32>, vector<2x24xf32> -> vector<2x24xf32>
    %c415 = arith.constant 415 : index
    %c0_48 = arith.constant 0 : index
    %155 = vector.load %arg2[%c415, %c0_48] : memref<424x128xf32, #tpu.memory_space<vmem>>, vector<1x24xf32>
    %156 = vector.broadcast %155 : vector<1x24xf32> to vector<2x24xf32>
    %157 = arith.addf %154, %156 : vector<2x24xf32>
    %cst_49 = arith.constant 0.000000e+00 : f32
    %158 = vector.broadcast %cst_49 : f32 to vector<2x24xf32>
    %159 = arith.maximumf %157, %158 : vector<2x24xf32>
    %c384 = arith.constant 384 : index
    %c0_50 = arith.constant 0 : index
    %160 = vector.load %arg2[%c384, %c0_50] : memref<424x128xf32, #tpu.memory_space<vmem>>, vector<24x10xf32>
    %cst_51 = arith.constant dense<0.000000e+00> : vector<2x10xf32>
    %161 = tpu.matmul %159, %160, %cst_51 {dimension_numbers = #tpu.dot_dimension_numbers<[1], [0], [0], [1], [0, 0, 1, 1], [], []>} : vector<2x24xf32>, vector<24x10xf32>, vector<2x10xf32> -> vector<2x10xf32>
    %c416 = arith.constant 416 : index
    %c0_52 = arith.constant 0 : index
    %162 = vector.load %arg2[%c416, %c0_52] : memref<424x128xf32, #tpu.memory_space<vmem>>, vector<1x10xf32>
    %163 = vector.broadcast %162 : vector<1x10xf32> to vector<2x10xf32>
    %164 = arith.addf %161, %163 : vector<2x10xf32>
    %cst_53 = arith.constant 0.000000e+00 : f32
    %165 = vector.broadcast %cst_53 : f32 to vector<2x70xf32>
    %166 = tpu.concatenate %164, %152, %165 in 1 : vector<2x10xf32>, vector<2x48xf32>, vector<2x70xf32> -> vector<2x128xf32>
    %cst_54 = arith.constant 0.000000e+00 : f32
    %167 = vector.broadcast %cst_54 : f32 to vector<6x128xf32>
    %168 = tpu.concatenate %166, %167 in 0 : vector<2x128xf32>, vector<6x128xf32> -> vector<8x128xf32>
    %c0_55 = arith.constant 0 : index
    %c0_56 = arith.constant 0 : index
    %169 = vector.load %arg3[%c0_55, %c0_56] : memref<8x128xf32, #tpu.memory_space<vmem>>, vector<8x128xf32>
    tpu.vector_store %arg3[%c0_55, %c0_56], %168 {strides = array<i32>} : memref<8x128xf32, #tpu.memory_space<vmem>>, vector<8x128xf32>,
    return
  }
}

</mosaic_0001>

<bundles_post_ra>
// kernel: cnn_decoder_pallas.1
= control target key start
LH: loop header
LB: loop body
LE: loop exit
PB: predicated region body
PF: predicated region fallthrough
CT: control target
= control target key end

     0   :  { %8 = vsyncpa [#allocation3], 0  ;;  %s1086_s15 = smov [#allocation2]   ;;  %s1087_s17 = smov 128   ;;  %s1442_s0 = inlined_call_operand.vmem [shape: f32[2,8], index: 0, kind: input, shape index: {}]   ;;  %s1443_s1 = inlined_call_operand.vmem [shape: f32[2,3,16], index: 1, kind: input, shape index: {}]   ;;  %s1444_s2 = inlined_call_operand.hbm [shape: f32[424,128], index: 2, kind: input, shape index: {}]   ;;  %s1445_s3 = inlined_call_operand.vmem [shape: f32[8,128], index: 3, kind: output, shape index: {}]  }
   0x1   :  { %s17_s14 = sshll.u32 %s1444_s2, 4  ;;  %s19_s16 = sshll.u32 %s1086_s15, 4  ;;  %s18_s14 = int_to_ptr.hbm [resolvable:$true] %s17_s14  ;;  %s20_s16 = int_to_ptr.vmem [resolvable:$true] %s19_s16 }
   0x2   :  { %s1088_s18 = smov 8  }
   0x3   :  { %25 = dma.hbm_to_vmem [thread:$0]  %s18_s14, 6784, %s20_s16, [#allocation3], %s1087_s17, %s1087_s17, %s1088_s18  }
   0x4   :  { %1084 = dma.done.wait [#allocation3], 6784  }
   0x5   :  { %1085 = vsyncadd [#allocation3], 4294960512  ;;  %v66_v0 = vld [vmem:[%s1443_s1] sm:$0x1]  ;;  %v67_v1 = vld [vmem:[%s1443_s1 + $0x4] sm:$0x1]  ;;  %v30_v12 = vlaneseq }
   0x6   :  { %vm75_vm0 = vcmask 1041409   ;;  %v74_v2 = vrot.slane %v67_v1, 7  ;;  %v69_v3 = vld [vmem:[%s1443_s1 + $0x5] sm:$0x1]  ;;  %v70_v4 = vld [vmem:[%s1443_s1 + $0x2] sm:$0x1] }
   0x7   :  { %v71_v5 = vld [vmem:[%s1443_s1 + $0x6] sm:$0x1]  ;;  %s1089_s28 = smov 16   ;;  %v82_v8 = vrot.slane %v69_v3, 7  ;;  %v68_v10 = vld [vmem:[%s1443_s1 + $0x1] sm:$0x1] }
   0x8   :  { %v76_v6 = vsel %vm75_vm0, %v74_v2, %v66_v0  ;;  %v89_v7 = vrot.slane %v71_v5, 7  ;;  %s1090_s4 = smov 48   ;;  %s1091_s5 = smov 32   ;;  %v1139_v13 = vshrl.u32 %v30_v12, 7  ;;  %vm64_vm1 = vcmask 64512   ;;  %v325_v22 = vld [vmem:[#allocation2 + $0x20] sm:$0xff] }
   0x9   :  { %77 = vrot.lane.b32.xlu0 %v76_v6, %s1089_s28  ;;  %v83_v11 = vsel %vm75_vm0, %v82_v8, %v68_v10  ;;  %v63_v15 = vld [vmem:[%s1442_s0] sm:$0x3]  ;;  %v1144_v16 = vand.u32 127, %v30_v12  ;;  %vm94_vm2 = vcmask 130048   ;;  %vm96_vm3 = vcmask 261120   ;;  %s1094_s0 = smov 112  }
   0xa   :  { %v90_v9 = vsel %vm75_vm0, %v89_v7, %v70_v4  ;;  %v102_v17 = vshra.s32 %v1139_v13, 4  ;;  %v65_v18 = vsel %vm64_vm1, %v63_v15, 0.0  ;;  %v180_v19 = vadd.s32 56, %v1139_v13  ;;  %s1095_s1 = smov 106  }
   0xb   :  { %91 = vrot.lane.b32.xlu1 %v90_v9, %s1090_s4  ;;  %v179_v20 = vadd.s32 48, %v1139_v13  ;;  %v178_v21 = vadd.s32 40, %v1139_v13  ;;  %v1156_v23 = vadd.s32 8, %v1139_v13  ;;  %v177_v24 = vadd.s32 32, %v1139_v13 }
   0xc   :  { %vm1151_vm4 = vcmp.eq.s32.totalorder %v1144_v16, %v102_v17  ;;  %v184_v25 = vshra.s32 %v180_v19, 4  ;;  %vm98_vm5 = vcmask 392192   ;;  %vm131_vm6 = vcmask 1041408  }
   0xd   :  { %v183_v26 = vshra.s32 %v179_v20, 4  ;;  %v182_v27 = vshra.s32 %v178_v21, 4  ;;  %v34_v29 = vadd.s32 24, %v1139_v13  ;;  %v181_v32 = vshra.s32 %v177_v24, 4  ;;  %v326_v21 = vld [vmem:[#allocation2 + $0x28] sm:$0xff]  ;;  %v324_v24 = vld [vmem:[#allocation2 + $0x18] sm:$0xff] }
   0xe   :  { %vm192_vm7 = vcmp.eq.s32.totalorder %v184_v25, %v1144_v16  ;;  %v1092_v34 = vmov 0.0   ;;  %vm118_vm9 = vcmask 15360   ;;  %v1093_v36 = vmov 1.0   ;;  %351 = vmatpush.msra.mxu2 %v326_v21  ;;  %1034 = vmatpush.msra.mxu3 %v326_v21  ;;  %v323_v25 = vld [vmem:[#allocation2 + $0x10] sm:$0xff] }
   0xf   :  { %vm191_vm8 = vcmp.eq.s32.totalorder %v183_v26, %v1144_v16  ;;  %v964_v35 = vsel %vm1151_vm4, 1.0, %v1092_v34  ;;  %985 = vmatpush.msk.msra.mxu1 %vm192_vm7, %v1093_v36  ;;  %v103_v38 = vshra.s32 %v1156_v23, 4  ;;  %v33_v39 = vadd.s32 16, %v1139_v13  ;;  %v322_v26 = vld [vmem:[#allocation2 + $0x8] sm:$0xff] }
  0x10   :  { %vm190_vm10 = vcmp.eq.s32.totalorder %v182_v27, %v1144_v16  ;;  %v105_v40 = vshra.s32 %v34_v29, 4  ;;  %vm189_vm11 = vcmp.eq.s32.totalorder %v181_v32, %v1144_v16  ;;  %vm185_vm4 = vcmp.eq.s32.totalorder %v102_v17, %v1144_v16  ;;  %352 = vmatpush.msra.mxu2 %v325_v22  ;;  %1035 = vmatpush.msra.mxu3 %v325_v22  ;;  %v321_v27 = vld [vmem:[#allocation2] sm:$0xff] }
  0x11   :  { %84 = vrot.lane.b32.xlu0 %v83_v11, %s1091_s5  ;;  %986 = vmatpush.msk.msra.mxu1 %vm191_vm8, %v1093_v36  ;;  %vm107_vm12 = vcmp.eq.s32.totalorder %v1144_v16, %v103_v38  ;;  %v104_v41 = vshra.s32 %v33_v39, 4  ;;  %vm186_vm1 = vcmp.eq.s32.totalorder %v103_v38, %v1144_v16  ;;  %v1196_v45 = vand.u32 15, %v1139_v13 }
  0x12   :  { %vm188_vm13 = vcmp.eq.s32.totalorder %v105_v40, %v1144_v16  ;;  %v965_v42 = vsel %vm107_vm12, 1.0, %v1092_v34  ;;  %vm109_vm0 = vcmp.eq.s32.totalorder %v1144_v16, %v105_v40  ;;  %v1199_v46 = vand.u32 15, %v1144_v16  ;;  %353 = vmatpush.msra.mxu2 %v324_v24  ;;  %1036 = vmatpush.msra.mxu3 %v324_v24 }
  0x13   :  { %987 = vmatpush.msk.msra.mxu1 %vm190_vm10, %v1093_v36  ;;  %vm187_vm14 = vcmp.eq.s32.totalorder %v104_v41, %v1144_v16  ;;  %vm108_vm15 = vcmp.eq.s32.totalorder %v1144_v16, %v104_v41  ;;  %v967_v44 = vsel %vm109_vm0, 1.0, %v1092_v34  ;;  %v1205_v48 = vand.u32 15, %v1156_v23 }
  0x14   :  { %v966_v43 = vsel %vm108_vm15, 1.0, %v1092_v34  ;;  %vm165_vm7 = vcmp.eq.s32.totalorder %v1199_v46, %v1196_v45  ;;  %vm213_vm8 = vcmask 523264   ;;  %v1211_v52 = vand.u32 15, %v33_v39  ;;  %354 = vmatpush.msra.mxu2 %v323_v25  ;;  %1037 = vmatpush.msra.mxu3 %v323_v25 }
  0x15   :  { %988 = vmatpush.msk.msra.mxu1 %vm189_vm11, %v1093_v36  ;;  %v973_v47 = vsel %vm165_vm7, 1.0, %v1092_v34  ;;  %v1217_v56 = vand.u32 15, %v34_v29  ;;  %vm272_vm12 = vcmp.lt.s32.totalorder %v1139_v13, 7  ;;  %vm39_vm0 = vcmp.ne.s32.totalorder %v1196_v45, 0 }
  0x16   :  { %vm167_vm10 = vcmp.eq.s32.totalorder %v1199_v46, %v1211_v52  ;;  %355 = vmatpush.msra.mxu2 %v322_v26  ;;  %1038 = vmatpush.msra.mxu3 %v322_v26  ;;  %v1258_v29 = vsel %vm39_vm0, 1.0, %v1092_v34 }
  0x17   :  { %989 = vmatpush.msk.msra.mxu1 %vm188_vm13, %v1093_v36  ;;  %v975_v55 = vsel %vm167_vm10, 1.0, %v1092_v34  ;;  %vm168_vm11 = vcmp.eq.s32.totalorder %v1199_v46, %v1217_v56  ;;  %vm259_vm13 = vcmp.lt.s32.totalorder %v1139_v13, 1  ;;  %vm54_vm15 = vcmp.ne.s32.totalorder %v1217_v56, 15 }
  0x18   :  { %v976_v59 = vsel %vm168_vm11, 1.0, %v1092_v34  ;;  %v1246_v17 = vsel %vm54_vm15, 1.0, %v1092_v34  ;;  %356 = vmatpush.msra.mxu2 %v321_v27  ;;  %1039 = vmatpush.msra.mxu3 %v321_v27  ;;  %vm643_vm11 = vcmp.eq.s32.totalorder %v1199_v46, %v1156_v23 }
  0x19   :  { %990 = vmatpush.msk.msra.mxu1 %vm187_vm14, %v1093_v36  ;;  %vm52_vm14 = vcmp.ne.s32.totalorder %v1205_v48, 15 }
  0x1a   :  { %v1235_v9 = vsel %vm52_vm14, 1.0, %v1092_v34 }
  0x1b   :  { %991 = vmatpush.msk.msra.mxu1 %vm186_vm1, %v1093_v36  ;;  %vm41_vm1 = vcmp.ne.s32.totalorder %v1211_v52, 0 }
  0x1d   :  { %992 = vmatpush.msk.msra.mxu1 %vm185_vm4, %v1093_v36 }
  0x7b   :  { %v78_v14 = vpop.permute.xlu0 %77 }
  0x7c   :  { %v95_v30 = vsel %vm94_vm2, %v65_v18, %v78_v14 }
  0x7d   :  { %v92_v28 = vpop.permute.xlu1 %91 }
  0x83   :  { %v85_v31 = vpop.permute.xlu0 %84 }
  0x84   :  { %v97_v33 = vsel %vm96_vm3, %v95_v30, %v85_v31 }
  0x85   :  { %v99_v37 = vsel %vm98_vm5, %v97_v33, %v92_v28 }
  0x86   :  { %968 = vmatpush.msk.msra.mxu0 %vm131_vm6, %v99_v37 }
  0x87   :  { %969 = vmatmul.msk.f32.vlgmr.msra.gmra.mxu0 %vm118_vm9, %v964_v35 }
  0x88   :  { %1018 = vmatpush.msk.msrb.mxu0 %vm643_vm11, %v1093_v36  ;;  %vm949_vm11 = vcmask 80896  }
  0x8f   :  { %970 = vmatmul.msk.f32.gmra.mxu0 %vm118_vm9, %v965_v42  ;;  %v1269_v42 = vsel %vm41_vm1, 1.0, %v1092_v34 }
  0x97   :  { %971 = vmatmul.msk.f32.gmra.mxu0 %vm118_vm9, %v966_v43 }
  0x9f   :  { %972 = vmatmul.msk.f32.gmra.mxu0 %vm118_vm9, %v967_v44  ;;  %vm166_vm9 = vcmp.eq.s32.totalorder %v1199_v46, %v1205_v48 }
  0xa0   :  { %v974_v51 = vsel %vm166_vm9, 1.0, %v1092_v34 }
 0x104   :  { %v152_v49 = vpop.f32.mrf.mxu0 }
 0x105   :  { %v209_v50 = vmul.f32 %v973_v47, %v152_v49 }
 0x107   :  { %993 = vmatmul.msk.f32.vlgmr.msra.gmra.mxu1 %vm213_vm8, %v209_v50 }
 0x10c   :  { %v155_v53 = vpop.f32.mrf.mxu0 }
 0x10d   :  { %v210_v54 = vmul.f32 %v974_v51, %v155_v53 }
 0x10f   :  { %994 = vmatmul.msk.f32.gmra.mxu1 %vm213_vm8, %v210_v54 }
 0x114   :  { %v158_v57 = vpop.f32.mrf.mxu0 }
 0x115   :  { %v211_v58 = vmul.f32 %v975_v55, %v158_v57 }
 0x117   :  { %995 = vmatmul.msk.f32.gmra.mxu1 %vm213_vm8, %v211_v58  ;;  %v1050_v58 = vld [vmem:[#allocation2 + $0x198] ss:$0 sm:$0xff] }
 0x11c   :  { %v161_v60 = vpop.f32.mrf.mxu0 }
 0x11d   :  { %v212_v61 = vmul.f32 %v976_v59, %v161_v60 }
 0x11f   :  { %996 = vmatmul.msk.f32.gmra.mxu1 %vm213_vm8, %v212_v61 }
 0x184   :  { %v243_v62 = vpop.f32.mrf.mxu1 }
 0x185   :  { %285 = vrot.lane.b32.xlu1 %v243_v62, %s1089_s28  ;;  %v255_v0 = vrot.slane %v243_v62, 7  ;;  %v268_v1 = vrot.slane %v243_v62, 1 }
 0x18c   :  { %v246_v63 = vpop.f32.mrf.mxu1 }
 0x18d   :  { %v256_v2 = vrot.slane %v246_v63, 7  ;;  %v269_v3 = vrot.slane %v246_v63, 1 }
 0x18f   :  { %v275_v4 = vsel %vm272_vm12, %v268_v1, %v269_v3  ;;  %v262_v5 = vsel %vm259_vm13, %v255_v0, %v256_v2 }
 0x190   :  { %301 = vrot.lane.b32.xlu2 %v275_v4, %s1091_s5 }
 0x194   :  { %v249_v6 = vpop.f32.mrf.mxu1 }
 0x195   :  { %v257_v7 = vrot.slane %v249_v6, 7  ;;  %v270_v8 = vrot.slane %v249_v6, 1  ;;  %289 = vrot.lane.b32.xlu1 %v249_v6, %s1089_s28 }
 0x197   :  { %v274_v10 = vsel %vm272_vm12, %v269_v3, %v270_v8  ;;  %v261_v11 = vsel %vm259_vm13, %v256_v2, %v257_v7 }
 0x198   :  { %287 = vrot.lane.b32.xlu2 %v246_v63, %s1089_s28  ;;  %v278_v12 = vmul.f32 %v1235_v9, %v274_v10  ;;  %v266_v44 = vmul.f32 %v1269_v42, %v261_v11 }
 0x19a   :  { %303 = vrot.lane.b32.xlu0 %v278_v12, %s1091_s5 }
 0x19c   :  { %v252_v14 = vpop.f32.mrf.mxu1 }
 0x19d   :  { %v271_v15 = vrot.slane %v252_v14, 1  ;;  %v258_v28 = vrot.slane %v252_v14, 7 }
 0x19f   :  { %v273_v18 = vsel %vm272_vm12, %v270_v8, %v271_v15  ;;  %v276_v19 = vsel %vm272_vm12, %v271_v15, %v268_v1  ;;  %v263_v30 = vsel %vm259_vm13, %v258_v28, %v255_v0  ;;  %v260_v51 = vsel %vm259_vm13, %v257_v7, %v258_v28 }
 0x1a0   :  { %305 = vrot.lane.b32.xlu2 %v273_v18, %s1091_s5  ;;  %v280_v20 = vmul.f32 %v1246_v17, %v276_v19  ;;  %v264_v31 = vmul.f32 %v1258_v29, %v263_v30 }
 0x1a2   :  { %291 = vrot.lane.b32.xlu0 %v252_v14, %s1089_s28  ;;  %307 = vrot.lane.b32.xlu1 %v280_v20, %s1091_s5 }
 0x1ea   :  { %v302_v33 = vpop.permute.xlu2 %301 }
 0x1f2   :  { %v288_v38 = vpop.permute.xlu2 %287 }
 0x1f3   :  { %v314_v39 = vsel %vm94_vm2, %v262_v5, %v288_v38 }
 0x1f7   :  { %v286_v32 = vpop.permute.xlu1 %285 }
 0x1f8   :  { %v313_v35 = vsel %vm94_vm2, %v264_v31, %v286_v32 }
 0x1f9   :  { %v317_v37 = vsel %vm96_vm3, %v313_v35, %v302_v33 }
 0x1fa   :  { %997 = vmatmul.msk.f32.vlgmr.msra.gmra.mxu2 %vm98_vm5, %v317_v37  ;;  %v306_v49 = vpop.permute.xlu2 %305 }
 0x207   :  { %v290_v40 = vpop.permute.xlu1 %289 }
 0x208   :  { %v315_v47 = vsel %vm94_vm2, %v266_v44, %v290_v40 }
 0x209   :  { %v319_v55 = vsel %vm96_vm3, %v315_v47, %v306_v49 }
 0x20c   :  { %v304_v41 = vpop.permute.xlu0 %303 }
 0x20d   :  { %v318_v43 = vsel %vm96_vm3, %v314_v39, %v304_v41 }
 0x20e   :  { %998 = vmatmul.msk.f32.gmra.mxu2 %vm98_vm5, %v318_v43 }
 0x214   :  { %v292_v50 = vpop.permute.xlu0 %291  ;;  %v308_v53 = vpop.permute.xlu1 %307 }
 0x215   :  { %v316_v54 = vsel %vm94_vm2, %v260_v51, %v292_v50 }
 0x216   :  { %999 = vmatmul.msk.f32.gmra.mxu2 %vm98_vm5, %v319_v55  ;;  %v320_v57 = vsel %vm96_vm3, %v316_v54, %v308_v53  ;;  %v370_v53 = vld [vmem:[#allocation2 + $0x199] sm:$0x1] }
 0x217   :  { %1000 = vmatmul.msk.f32.vlgmr.msra.gmra.mxu3 %vm98_vm5, %v320_v57  ;;  %v371_v57 = vld [vmem:[#allocation2 + $0x19a] sm:$0x1] }
 0x27d   :  { %v358_v59 = vpop.f32.mrf.mxu2 }
 0x27e   :  { %v1282_v60 = vadd.f32 %v1050_v58, %v358_v59 }
 0x280   :  { %v372_v61 = vmul.f32 %v1282_v60, %v1282_v60 }
 0x282   :  { %380 = vrot.lane.b32.xlu2 %v372_v61, %s1089_s28 }
 0x291   :  { %v361_v62 = vpop.f32.mrf.mxu2 }
 0x292   :  { %v362_v63 = vadd.f32 %v1050_v58, %v361_v62 }
 0x294   :  { %v373_v0 = vmul.f32 %v362_v63, %v362_v63 }
 0x296   :  { %382 = vrot.lane.b32.xlu0 %v373_v0, %s1089_s28 }
 0x299   :  { %v364_v1 = vpop.f32.mrf.mxu2 }
 0x29a   :  { %v365_v2 = vadd.f32 %v1050_v58, %v364_v1  ;;  %v367_v3 = vpop.f32.mrf.mxu3 }
 0x29b   :  { %v368_v4 = vadd.f32 %v1050_v58, %v367_v3 }
 0x29c   :  { %v374_v5 = vmul.f32 %v365_v2, %v365_v2 }
 0x29d   :  { %v375_v6 = vmul.f32 %v368_v4, %v368_v4 }
 0x29e   :  { %384 = vrot.lane.b32.xlu1 %v374_v5, %s1089_s28 }
 0x29f   :  { %386 = vrot.lane.b32.xlu2 %v375_v6, %s1089_s28 }
 0x2dc   :  { %v381_v7 = vpop.permute.xlu2 %380 }
 0x2dd   :  { %v392_v11 = vsel %vm94_vm2, %v1282_v60, %v381_v7 }
 0x2de   :  { %v396_v15 = vsel %vm96_vm3, %v392_v11, 0.0 }
 0x2f9   :  { %v387_v12 = vpop.permute.xlu2 %386 }
 0x2fa   :  { %v395_v19 = vsel %vm94_vm2, %v368_v4, %v387_v12 }
 0x2fb   :  { %v401_v25 = vsel %vm96_vm3, %v395_v19, 0.0 }
 0x308   :  { %v383_v8 = vpop.permute.xlu0 %382 }
 0x309   :  { %v393_v10 = vsel %vm94_vm2, %v362_v63, %v383_v8 }
 0x30a   :  { %v397_v14 = vsel %vm96_vm3, %v393_v10, 0.0 }
 0x30b   :  { %v398_v20 = vadd.f32 %v397_v14, %v396_v15 }
 0x310   :  { %v385_v18 = vpop.permute.xlu1 %384 }
 0x311   :  { %v394_v21 = vsel %vm94_vm2, %v365_v2, %v385_v18 }
 0x312   :  { %v399_v22 = vsel %vm96_vm3, %v394_v21, 0.0 }
 0x313   :  { %v400_v24 = vadd.f32 %v399_v22, %v398_v20 }
 0x315   :  { %v402_v26 = vadd.f32 %v401_v25, %v400_v24 }
 0x317   :  { %v403_v27 = vrot.slane %v402_v26, 4 }
 0x319   :  { %v404_v28 = vadd.f32 %v403_v27, %v402_v26 }
 0x31b   :  { %v405_v30 = vrot.slane %v404_v28, 2 }
 0x31d   :  { %v406_v31 = vadd.f32 %v405_v30, %v404_v28 }
 0x31f   :  { %v407_v32 = vrot.slane %v406_v31, 1 }
 0x321   :  { %v408_v33 = vadd.f32 %v407_v32, %v406_v31 }
 0x323   :  { %v409_v35 = vmul.f32 0.03125, %v408_v33 }
 0x325   :  { %v410_v37 = vmul.f32 %v409_v35, %v409_v35 }
 0x327   :  { %412 = vrot.lane.b32.xlu0 %v410_v37, %s1089_s28  ;;  %v515_v37 = vld [vmem:[#allocation2 + $0x48] sm:$0xff] }
 0x399   :  { %v413_v38 = vpop.permute.xlu0 %412 }
 0x39a   :  { %v415_v39 = vsub.f32 %v409_v35, %v413_v38  ;;  %v514_v38 = vld [vmem:[#allocation2 + $0x40] sm:$0xff] }
 0x39c   :  { %v416_v40 = vadd.f32 1e-05, %v415_v39  ;;  %v513_v39 = vld [vmem:[#allocation2 + $0x38] sm:$0xff] }
 0x39e   :  { %1056 = vrsqrt.f32 %v416_v40  ;;  %vm423_vm7 = vweird.f32 %v416_v40 }
 0x3a4   :  { %v1057_v41 = vpop.eup %1056 }
 0x3a5   :  { %v418_v43 = vmul.f32 %v1057_v41, %v416_v40  ;;  %vm424_vm4 = vweird.f32 %v1057_v41  ;;  %v512_v40 = vld [vmem:[#allocation2 + $0x30] sm:$0xff] }
 0x3a6   :  { %vm425_vm8 = vmor %vm423_vm7, %vm424_vm4 }
 0x3a7   :  { %v419_v44 = vmul.f32 %v1057_v41, %v418_v43 }
 0x3a9   :  { %v420_v47 = vmul.f32 0.5, %v419_v44 }
 0x3ab   :  { %v421_v49 = vsub.f32 1.5, %v420_v47 }
 0x3ad   :  { %v422_v50 = vmul.f32 %v1057_v41, %v421_v49 }
 0x3af   :  { %v426_v51 = vsel %vm425_vm8, %v1057_v41, %v422_v50 }
 0x3b0   :  { %428 = vrot.lane.b32.xlu1 %v426_v51, %s1094_s0 }
 0x422   :  { %v429_v54 = vpop.permute.xlu1 %428 }
 0x423   :  { %v431_v55 = vmul.f32 %v429_v54, %v370_v53 }
 0x425   :  { %v432_v58 = vperm.slane %v431_v55, 0  ;;  %v437_v59 = vmul.f32 %v431_v55, %v409_v35  ;;  %v517_v35 = vld [vmem:[#allocation2 + $0x58] sm:$0xff] }
 0x426   :  { %542 = vmatpush.msrb.mxu3 %v517_v35 }
 0x427   :  { %v438_v61 = vsub.f32 %v371_v57, %v437_v59  ;;  %v435_v62 = vmul.f32 %v432_v58, %v365_v2  ;;  %v436_v0 = vmul.f32 %v432_v58, %v368_v4  ;;  %v434_v3 = vmul.f32 %v432_v58, %v362_v63 }
 0x428   :  { %v433_v5 = vmul.f32 %v432_v58, %v1282_v60 }
 0x429   :  { %v439_v1 = vperm.slane %v438_v61, 0 }
 0x42b   :  { %v441_v6 = vadd.f32 %v439_v1, %v434_v3  ;;  %v440_v7 = vadd.f32 %v439_v1, %v433_v5  ;;  %v442_v8 = vadd.f32 %v439_v1, %v435_v62  ;;  %v443_v10 = vadd.f32 %v439_v1, %v436_v0  ;;  %v1051_v1 = vld [vmem:[#allocation2 + $0x19b] ss:$0 sm:$0xff] }
 0x42d   :  { %v445_v11 = vmax.f32 %v441_v6, 0.0  ;;  %v444_v12 = vmax.f32 %v440_v7, 0.0  ;;  %v446_v14 = vmax.f32 %v442_v8, 0.0  ;;  %v447_v15 = vmax.f32 %v443_v10, 0.0 }
 0x42f   :  { %478 = vrot.lane.b32.xlu1 %v445_v11, %s1089_s28  ;;  %476 = vrot.lane.b32.xlu2 %v444_v12, %s1089_s28  ;;  %v448_v18 = vrot.slane %v444_v12, 7  ;;  %v460_v19 = vrot.slane %v444_v12, 1  ;;  %v461_v2 = vrot.slane %v445_v11, 1  ;;  %v462_v4 = vrot.slane %v446_v14, 1 }
 0x430   :  { %v451_v20 = vrot.slane %v447_v15, 7  ;;  %v450_v63 = vrot.slane %v446_v14, 7  ;;  %v449_v21 = vrot.slane %v445_v11, 7  ;;  %v463_v22 = vrot.slane %v447_v15, 1 }
 0x431   :  { %v466_v60 = vsel %vm272_vm12, %v460_v19, %v461_v2  ;;  %v465_v24 = vsel %vm272_vm12, %v461_v2, %v462_v4 }
 0x432   :  { %492 = vrot.lane.b32.xlu0 %v466_v60, %s1091_s5  ;;  %v455_v25 = vsel %vm259_vm13, %v451_v20, %v448_v18  ;;  %v452_v26 = vsel %vm259_vm13, %v450_v63, %v451_v20  ;;  %v454_v27 = vsel %vm259_vm13, %v448_v18, %v449_v21  ;;  %v453_v28 = vsel %vm259_vm13, %v449_v21, %v450_v63 }
 0x433   :  { %v469_v30 = vmul.f32 %v1235_v9, %v465_v24  ;;  %v464_v31 = vsel %vm272_vm12, %v462_v4, %v463_v22  ;;  %v467_v32 = vsel %vm272_vm12, %v463_v22, %v460_v19  ;;  %v516_v9 = vld [vmem:[#allocation2 + $0x50] sm:$0xff]  ;;  %v456_v43 = vmul.f32 %v1258_v29, %v455_v25 }
 0x434   :  { %v471_v33 = vmul.f32 %v1246_v17, %v467_v32  ;;  %543 = vmatpush.msrb.mxu3 %v516_v9  ;;  %v458_v55 = vmul.f32 %v1269_v42, %v453_v28  ;;  %vm641_vm12 = vcmp.eq.s32.totalorder %v1199_v46, %v1139_v13 }
 0x435   :  { %1019 = vmatpush.msk.msrb.mxu0 %vm641_vm12, %v1093_v36  ;;  %vm951_vm12 = vcmask 474112  }
 0x436   :  { %544 = vmatpush.msrb.mxu3 %v515_v37 }
 0x437   :  { %496 = vrot.lane.b32.xlu1 %v464_v31, %s1091_s5  ;;  %494 = vrot.lane.b32.xlu2 %v469_v30, %s1091_s5 }
 0x438   :  { %545 = vmatpush.msrb.mxu3 %v514_v38 }
 0x43a   :  { %480 = vrot.lane.b32.xlu0 %v446_v14, %s1089_s28  ;;  %546 = vmatpush.msrb.mxu3 %v513_v39 }
 0x43c   :  { %547 = vmatpush.msrb.mxu3 %v512_v40 }
 0x43f   :  { %482 = vrot.lane.b32.xlu2 %v447_v15, %s1089_s28 }
 0x442   :  { %498 = vrot.lane.b32.xlu0 %v471_v33, %s1091_s5 }
 0x489   :  { %v477_v41 = vpop.permute.xlu2 %476 }
 0x48a   :  { %v504_v44 = vsel %vm94_vm2, %v456_v43, %v477_v41 }
 0x491   :  { %v495_v51 = vpop.permute.xlu2 %494 }
 0x499   :  { %v483_v59 = vpop.permute.xlu2 %482 }
 0x49a   :  { %v507_v62 = vsel %vm94_vm2, %v452_v26, %v483_v59 }
 0x4a1   :  { %v479_v49 = vpop.permute.xlu1 %478 }
 0x4a2   :  { %v505_v50 = vsel %vm94_vm2, %v454_v27, %v479_v49 }
 0x4a3   :  { %v509_v53 = vsel %vm96_vm3, %v505_v50, %v495_v51 }
 0x4a4   :  { %v493_v17 = vpop.permute.xlu0 %492 }
 0x4a5   :  { %v508_v47 = vsel %vm96_vm3, %v504_v44, %v493_v17 }
 0x4a6   :  { %1001 = vmatmul.msk.f32.vlgmr.msrb.gmra.mxu3 %vm98_vm5, %v508_v47 }
 0x4a9   :  { %v497_v57 = vpop.permute.xlu1 %496 }
 0x4ac   :  { %v481_v54 = vpop.permute.xlu0 %480 }
 0x4ad   :  { %v506_v29 = vsel %vm94_vm2, %v458_v55, %v481_v54  ;;  %v1379_v55 = vadd.s32 128, %v1144_v16 }
 0x4ae   :  { %1002 = vmatmul.msk.f32.gmra.mxu3 %vm98_vm5, %v509_v53  ;;  %v510_v58 = vsel %vm96_vm3, %v506_v29, %v497_v57  ;;  %v561_v57 = vld [vmem:[#allocation2 + $0x19c] sm:$0x1] }
 0x4af   :  { %v640_v29 = vand.u32 15, %v1379_v55 }
 0x4b1   :  { %vm644_vm13 = vcmp.eq.s32.totalorder %v640_v29, %v1156_v23  ;;  %vm642_vm14 = vcmp.eq.s32.totalorder %v640_v29, %v1139_v13 }
 0x4b2   :  { %1024 = vmatpush.msk.msrb.mxu2 %vm644_vm13, %v1093_v36 }
 0x4b4   :  { %v499_v61 = vpop.permute.xlu0 %498  ;;  %1025 = vmatpush.msk.msrb.mxu2 %vm642_vm14, %v1093_v36 }
 0x4b5   :  { %v511_v0 = vsel %vm96_vm3, %v507_v62, %v499_v61  ;;  %v562_v61 = vld [vmem:[#allocation2 + $0x19d] sm:$0x1] }
 0x4b6   :  { %1003 = vmatmul.msk.f32.gmra.mxu3 %vm98_vm5, %v510_v58 }
 0x4be   :  { %1004 = vmatmul.msk.f32.gmra.mxu3 %vm98_vm5, %v511_v0 }
 0x529   :  { %v549_v3 = vpop.f32.mrf.mxu3 }
 0x52a   :  { %v1342_v5 = vadd.f32 %v1051_v1, %v549_v3 }
 0x52c   :  { %v563_v42 = vmul.f32 %v1342_v5, %v1342_v5 }
 0x52e   :  { %571 = vrot.lane.b32.xlu1 %v563_v42, %s1089_s28 }
 0x531   :  { %v552_v6 = vpop.f32.mrf.mxu3 }
 0x532   :  { %v1347_v7 = vadd.f32 %v1051_v1, %v552_v6 }
 0x534   :  { %v564_v8 = vmul.f32 %v1347_v7, %v1347_v7 }
 0x536   :  { %573 = vrot.lane.b32.xlu2 %v564_v8, %s1089_s28 }
 0x539   :  { %v555_v10 = vpop.f32.mrf.mxu3 }
 0x53a   :  { %v1352_v11 = vadd.f32 %v1051_v1, %v555_v10 }
 0x53c   :  { %v565_v12 = vmul.f32 %v1352_v11, %v1352_v11 }
 0x53e   :  { %575 = vrot.lane.b32.xlu0 %v565_v12, %s1089_s28 }
 0x541   :  { %v558_v14 = vpop.f32.mrf.mxu3 }
 0x542   :  { %v1357_v15 = vadd.f32 %v1051_v1, %v558_v14 }
 0x544   :  { %v566_v18 = vmul.f32 %v1357_v15, %v1357_v15 }
 0x546   :  { %577 = vrot.lane.b32.xlu1 %v566_v18, %s1089_s28 }
 0x590   :  { %v574_v2 = vpop.permute.xlu2 %573 }
 0x591   :  { %v584_v63 = vsel %vm94_vm2, %v1347_v7, %v574_v2 }
 0x592   :  { %v588_v22 = vsel %vm96_vm3, %v584_v63, 0.0  ;;  %v818_v63 = vld [vmem:[#allocation2 + $0xd8] sm:$0xff] }
 0x593   :  { %835 = vmatpush.msra.mxu0 %v818_v63 }
 0x5a0   :  { %v572_v19 = vpop.permute.xlu1 %571 }
 0x5a1   :  { %v583_v20 = vsel %vm94_vm2, %v1342_v5, %v572_v19 }
 0x5a2   :  { %v587_v60 = vsel %vm96_vm3, %v583_v20, 0.0  ;;  %v833_v20 = vld [vmem:[#allocation2 + $0x150] sm:$0xff] }
 0x5a3   :  { %v589_v25 = vadd.f32 %v588_v22, %v587_v60  ;;  %v832_v60 = vld [vmem:[#allocation2 + $0x148] sm:$0xff]  ;;  %v831_v22 = vld [vmem:[#allocation2 + $0x140] sm:$0xff] }
 0x5b0   :  { %v576_v4 = vpop.permute.xlu0 %575 }
 0x5b1   :  { %v585_v21 = vsel %vm94_vm2, %v1352_v11, %v576_v4 }
 0x5b2   :  { %v590_v24 = vsel %vm96_vm3, %v585_v21, 0.0  ;;  %v817_v21 = vld [vmem:[#allocation2 + $0xd0] sm:$0xff] }
 0x5b3   :  { %v591_v27 = vadd.f32 %v590_v24, %v589_v25  ;;  %836 = vmatpush.msra.mxu0 %v817_v21  ;;  %v815_v24 = vld [vmem:[#allocation2 + $0xc0] sm:$0xff] }
 0x5b8   :  { %v578_v26 = vpop.permute.xlu1 %577 }
 0x5b9   :  { %v586_v28 = vsel %vm94_vm2, %v1357_v15, %v578_v26  ;;  %v830_v26 = vld [vmem:[#allocation2 + $0x138] sm:$0xff] }
 0x5ba   :  { %v592_v30 = vsel %vm96_vm3, %v586_v28, 0.0 }
 0x5bb   :  { %v593_v31 = vadd.f32 %v592_v30, %v591_v27  ;;  %v814_v27 = vld [vmem:[#allocation2 + $0xb8] sm:$0xff]  ;;  %v829_v30 = vld [vmem:[#allocation2 + $0x130] sm:$0xff] }
 0x5bd   :  { %v594_v32 = vrot.slane %v593_v31, 4 }
 0x5bf   :  { %v595_v33 = vadd.f32 %v594_v32, %v593_v31  ;;  %v653_v31 = vshra.s32 %v1144_v16, 4  ;;  %v813_v32 = vld [vmem:[#allocation2 + $0xb0] sm:$0xff]  ;;  %v654_v16 = vshra.s32 %v1379_v55, 4 }
 0x5c1   :  { %v596_v35 = vrot.slane %v595_v33, 2  ;;  %vm659_vm15 = vcmp.eq.s32.totalorder %v653_v31, %v1211_v52  ;;  %vm657_vm0 = vcmp.eq.s32.totalorder %v653_v31, %v1205_v48  ;;  %vm655_vm1 = vcmp.eq.s32.totalorder %v653_v31, %v1196_v45 }
 0x5c2   :  { %vm662_vm4 = vcmp.eq.s32.totalorder %v654_v16, %v1217_v56  ;;  %vm660_vm7 = vcmp.eq.s32.totalorder %v654_v16, %v1211_v52  ;;  %v1009_v55 = vsel %vm655_vm1, 1.0, %v1092_v34  ;;  %vm679_vm8 = vcmp.eq.s32.totalorder %v653_v31, %v1139_v13 }
 0x5c3   :  { %v597_v9 = vadd.f32 %v596_v35, %v595_v33  ;;  %v828_v33 = vld [vmem:[#allocation2 + $0x128] sm:$0xff]  ;;  %v1016_v29 = vsel %vm662_vm4, 1.0, %v1092_v34  ;;  %v1014_v52 = vsel %vm660_vm7, 1.0, %v1092_v34  ;;  %v1017_v13 = vsel %vm679_vm8, 1.0, %v1092_v34 }
 0x5c4   :  { %v812_v35 = vld [vmem:[#allocation2 + $0xa8] sm:$0xff] }
 0x5c5   :  { %v598_v37 = vrot.slane %v597_v9, 1 }
 0x5c7   :  { %v599_v38 = vadd.f32 %v598_v37, %v597_v9  ;;  %v827_v9 = vld [vmem:[#allocation2 + $0x120] sm:$0xff] }
 0x5c8   :  { %v811_v37 = vld [vmem:[#allocation2 + $0xa0] sm:$0xff] }
 0x5c9   :  { %v600_v39 = vmul.f32 0.03125, %v599_v38 }
 0x5cb   :  { %v601_v40 = vmul.f32 %v600_v39, %v600_v39 }
 0x5cd   :  { %603 = vrot.lane.b32.xlu2 %v601_v40, %s1089_s28  ;;  %v826_v40 = vld [vmem:[#allocation2 + $0x118] sm:$0xff] }
 0x627   :  { %v604_v41 = vpop.permute.xlu2 %603 }
 0x628   :  { %v606_v43 = vsub.f32 %v600_v39, %v604_v41  ;;  %v810_v41 = vld [vmem:[#allocation2 + $0x98] sm:$0xff] }
 0x62a   :  { %v607_v44 = vadd.f32 1e-05, %v606_v43  ;;  %v1013_v43 = vsel %vm659_vm15, 1.0, %v1092_v34 }
 0x62c   :  { %1058 = vrsqrt.f32 %v607_v44  ;;  %vm614_vm9 = vweird.f32 %v607_v44 }
 0x632   :  { %v1059_v17 = vpop.eup %1058 }
 0x633   :  { %v609_v47 = vmul.f32 %v1059_v17, %v607_v44  ;;  %vm615_vm5 = vweird.f32 %v1059_v17 }
 0x634   :  { %vm616_vm10 = vmor %vm614_vm9, %vm615_vm5  ;;  %vm658_vm5 = vcmp.eq.s32.totalorder %v654_v16, %v1205_v48  ;;  %vm656_vm9 = vcmp.eq.s32.totalorder %v654_v16, %v1196_v45 }
 0x635   :  { %v610_v49 = vmul.f32 %v1059_v17, %v609_v47 }
 0x637   :  { %v611_v50 = vmul.f32 0.5, %v610_v49  ;;  %v809_v49 = vld [vmem:[#allocation2 + $0x90] sm:$0xff] }
 0x639   :  { %v612_v51 = vsub.f32 1.5, %v611_v50  ;;  %v1011_v50 = vsel %vm657_vm0, 1.0, %v1092_v34 }
 0x63b   :  { %v613_v53 = vmul.f32 %v1059_v17, %v612_v51  ;;  %v824_v51 = vld [vmem:[#allocation2 + $0x108] sm:$0xff] }
 0x63d   :  { %v617_v54 = vsel %vm616_vm10, %v1059_v17, %v613_v53  ;;  %v825_v17 = vld [vmem:[#allocation2 + $0x110] sm:$0xff]  ;;  %vm921_vm10 = vcmask 195584  }
 0x63e   :  { %619 = vrot.lane.b32.xlu0 %v617_v54, %s1094_s0  ;;  %v808_v54 = vld [vmem:[#allocation2 + $0x88] sm:$0xff] }
 0x6b0   :  { %v620_v58 = vpop.permute.xlu0 %619 }
 0x6b1   :  { %v622_v59 = vmul.f32 %v620_v58, %v561_v57  ;;  %v823_v57 = vld [vmem:[#allocation2 + $0x100] sm:$0xff] }
 0x6b2   :  { %v807_v58 = vld [vmem:[#allocation2 + $0x80] sm:$0xff] }
 0x6b3   :  { %v623_v62 = vperm.slane %v622_v59, 0  ;;  %v628_v46 = vmul.f32 %v622_v59, %v600_v39 }
 0x6b5   :  { %v629_v0 = vsub.f32 %v562_v61, %v628_v46  ;;  %v624_v3 = vmul.f32 %v623_v62, %v1342_v5  ;;  %v625_v23 = vmul.f32 %v623_v62, %v1347_v7  ;;  %v626_v10 = vmul.f32 %v623_v62, %v1352_v11  ;;  %v834_v11 = vld [vmem:[#allocation2 + $0x158] sm:$0xff] }
 0x6b6   :  { %v627_v5 = vmul.f32 %v623_v62, %v1357_v15  ;;  %855 = vmatpush.msra.mxu2 %v834_v11  ;;  %v816_v15 = vld [vmem:[#allocation2 + $0xc8] sm:$0xff]  ;;  %v822_v46 = vld [vmem:[#allocation2 + $0xf8] sm:$0xff] }
 0x6b7   :  { %v630_v1 = vperm.slane %v629_v0, 0  ;;  %837 = vmatpush.msra.mxu0 %v816_v15  ;;  %v1012_v0 = vsel %vm658_vm5, 1.0, %v1092_v34  ;;  %v1053_v11 = vld [vmem:[#allocation2 + $0x19e] ss:$0 sm:$0xff] }
 0x6b8   :  { %856 = vmatpush.msra.mxu2 %v833_v20 }
 0x6b9   :  { %v631_v42 = vadd.f32 %v630_v1, %v624_v3  ;;  %v632_v8 = vadd.f32 %v630_v1, %v625_v23  ;;  %v633_v12 = vadd.f32 %v630_v1, %v626_v10  ;;  %v634_v18 = vadd.f32 %v630_v1, %v627_v5  ;;  %838 = vmatpush.msra.mxu0 %v815_v24  ;;  %v821_v1 = vld [vmem:[#allocation2 + $0xf0] sm:$0xff]  ;;  %v806_v23 = vld [vmem:[#allocation2 + $0x78] sm:$0xff]  ;;  %v1052_v10 = vld [vmem:[#allocation2 + $0x1a1] ss:$0 sm:$0xff] }
 0x6ba   :  { %857 = vmatpush.msra.mxu2 %v832_v60  ;;  %v1010_v3 = vsel %vm656_vm9, 1.0, %v1092_v34  ;;  %882 = vrot.lane.b32.xlu1 %v1052_v10, %s1091_s5  ;;  %v918_v24 = vld [vmem:[#allocation2 + $0x190] sm:$0xff] }
 0x6bb   :  { %v635_v6 = vmax.f32 %v631_v42, 0.0  ;;  %v636_v36 = vmax.f32 %v632_v8, 0.0  ;;  %v637_v14 = vmax.f32 %v633_v12, 0.0  ;;  %v638_v19 = vmax.f32 %v634_v18, 0.0  ;;  %839 = vmatpush.msra.mxu0 %v814_v27  ;;  %v820_v42 = vld [vmem:[#allocation2 + $0xe8] sm:$0xff]  ;;  %v819_v8 = vld [vmem:[#allocation2 + $0xe0] sm:$0xff] }
 0x6bc   :  { %858 = vmatpush.msra.mxu2 %v831_v22  ;;  %v803_v12 = vld [vmem:[#allocation2 + $0x60] sm:$0xff]  ;;  %v889_v18 = vld [vmem:[#allocation2 + $0x178] sm:$0xff] }
 0x6bd   :  { %1020 = vmatmul.msk.f32.vlgmr.msrb.gmra.mxu0 %vm94_vm2, %v635_v6  ;;  %1026 = vmatmul.msk.f32.vlgmr.msrb.gmra.mxu2 %vm94_vm2, %v635_v6  ;;  %v1054_v27 = vld [vmem:[#allocation2 + $0x19f] ss:$0 sm:$0xff] }
 0x6be   :  { %859 = vmatpush.msra.mxu2 %v830_v26  ;;  %840 = vmatpush.msra.mxu0 %v813_v32  ;;  %v916_v26 = vld [vmem:[#allocation2 + $0x180] sm:$0xff] }
 0x6bf   :  { %v1055_v32 = vld [vmem:[#allocation2 + $0x1a0] ss:$0 sm:$0xff] }
 0x6c0   :  { %860 = vmatpush.msra.mxu2 %v829_v30  ;;  %841 = vmatpush.msra.mxu0 %v812_v35 }
 0x6c2   :  { %861 = vmatpush.msra.mxu2 %v828_v33  ;;  %842 = vmatpush.msra.mxu0 %v811_v37 }
 0x6c4   :  { %862 = vmatpush.msra.mxu2 %v827_v9  ;;  %843 = vmatpush.msra.mxu0 %v810_v41 }
 0x6c5   :  { %1021 = vmatmul.msk.f32.gmra.mxu0 %vm94_vm2, %v636_v36  ;;  %1027 = vmatmul.msk.f32.gmra.mxu2 %vm94_vm2, %v636_v36  ;;  %v804_v36 = vld [vmem:[#allocation2 + $0x68] sm:$0xff] }
 0x6c6   :  { %863 = vmatpush.msra.mxu2 %v826_v40  ;;  %844 = vmatpush.msra.mxu0 %v809_v49 }
 0x6c8   :  { %864 = vmatpush.msra.mxu2 %v825_v17  ;;  %845 = vmatpush.msra.mxu0 %v808_v54 }
 0x6ca   :  { %865 = vmatpush.msra.mxu2 %v824_v51  ;;  %846 = vmatpush.msra.mxu0 %v807_v58 }
 0x6cc   :  { %866 = vmatpush.msra.mxu2 %v823_v57  ;;  %847 = vmatpush.msra.mxu0 %v806_v23 }
 0x6cd   :  { %1022 = vmatmul.msk.f32.gmra.mxu0 %vm94_vm2, %v637_v14  ;;  %1028 = vmatmul.msk.f32.gmra.mxu2 %vm94_vm2, %v637_v14 }
 0x6ce   :  { %867 = vmatpush.msra.mxu2 %v822_v46 }
 0x6d0   :  { %868 = vmatpush.msra.mxu2 %v821_v1 }
 0x6d2   :  { %869 = vmatpush.msra.mxu2 %v820_v42 }
 0x6d4   :  { %870 = vmatpush.msra.mxu2 %v819_v8 }
 0x6d5   :  { %1023 = vmatmul.msk.f32.gmra.mxu0 %vm94_vm2, %v638_v19  ;;  %1029 = vmatmul.msk.f32.gmra.mxu2 %vm94_vm2, %v638_v19  ;;  %vm661_vm2 = vcmp.eq.s32.totalorder %v653_v31, %v1217_v56  ;;  %v888_v19 = vld [vmem:[#allocation2 + $0x170] sm:$0xff] }
 0x6d6   :  { %v1015_v39 = vsel %vm661_vm2, 1.0, %v1092_v34  ;;  %v805_v34 = vld [vmem:[#allocation2 + $0x70] sm:$0xff] }
 0x6d7   :  { %848 = vmatpush.msra.mxu0 %v805_v34 }
 0x6d9   :  { %849 = vmatpush.msra.mxu0 %v804_v36 }
 0x6db   :  { %850 = vmatpush.msra.mxu0 %v803_v12 }
 0x72c   :  { %v883_v63 = vpop.permute.xlu1 %882 }
 0x73a   :  { %v1402_v7 = vpop.f32.mrf.mxu0 }
 0x73b   :  { %v752_v61 = vmul.f32 %v1009_v55, %v1402_v7  ;;  %v887_v7 = vld [vmem:[#allocation2 + $0x168] sm:$0xff] }
 0x740   :  { %v1404_v2 = vpop.f32.mrf.mxu2 }
 0x741   :  { %v753_v6 = vmul.f32 %v1010_v3, %v1404_v2  ;;  %v886_v2 = vld [vmem:[#allocation2 + $0x160] sm:$0xff] }
 0x742   :  { %v1406_v4 = vpop.f32.mrf.mxu0 }
 0x743   :  { %v754_v56 = vmul.f32 %v1011_v50, %v1406_v4 }
 0x748   :  { %v1408_v25 = vpop.f32.mrf.mxu2 }
 0x749   :  { %v755_v45 = vmul.f32 %v1012_v0, %v1408_v25  ;;  %v917_v25 = vld [vmem:[#allocation2 + $0x188] sm:$0xff] }
 0x74a   :  { %v717_v28 = vpop.f32.mrf.mxu0 }
 0x74b   :  { %v756_v53 = vmul.f32 %v1013_v43, %v717_v28 }
 0x750   :  { %v746_v38 = vpop.f32.mrf.mxu2 }
 0x751   :  { %v757_v48 = vmul.f32 %v1014_v52, %v746_v38 }
 0x752   :  { %v720_v44 = vpop.f32.mrf.mxu0 }
 0x753   :  { %v758_v47 = vmul.f32 %v1015_v39, %v720_v44 }
 0x755   :  { %775 = vmatpush.msra.mxu3 %v758_v47 }
 0x757   :  { %776 = vmatpush.msra.mxu3 %v756_v53 }
 0x758   :  { %v749_v59 = vpop.f32.mrf.mxu2 }
 0x759   :  { %v759_v62 = vmul.f32 %v1016_v29, %v749_v59  ;;  %777 = vmatpush.msra.mxu3 %v754_v56 }
 0x75b   :  { %778 = vmatpush.msra.mxu3 %v752_v61  ;;  %795 = vmatpush.msrb.mxu1 %v759_v62 }
 0x75c   :  { %1030 = vmatmul.msk.f32.vlgmr.msra.gmra.mxu3 %vm96_vm3, %v1017_v13 }
 0x75d   :  { %796 = vmatpush.msrb.mxu1 %v757_v48  ;;  %907 = vmatpush.msrb.mxu3 %v889_v18 }
 0x75f   :  { %797 = vmatpush.msrb.mxu1 %v755_v45  ;;  %908 = vmatpush.msrb.mxu3 %v888_v19 }
 0x761   :  { %798 = vmatpush.msrb.mxu1 %v753_v6  ;;  %909 = vmatpush.msrb.mxu3 %v887_v7 }
 0x762   :  { %1031 = vmatmul.msk.f32.vlgmr.msrb.gmra.mxu1 %vm96_vm3, %v1017_v13 }
 0x763   :  { %910 = vmatpush.msrb.mxu3 %v886_v2  ;;  %938 = vmatpush.msra.mxu1 %v918_v24 }
 0x765   :  { %939 = vmatpush.msra.mxu1 %v917_v25 }
 0x767   :  { %940 = vmatpush.msra.mxu1 %v916_v26 }
 0x7df   :  { %v800_v14 = vpop.f32.mrf.mxu1  ;;  %v780_v5 = vpop.f32.mrf.mxu3 }
 0x7e0   :  { %871 = vmatmul.f32.vlgmr.msra.gmra.mxu2 %v800_v14  ;;  %851 = vmatmul.f32.vlgmr.msra.gmra.mxu0 %v780_v5 }
 0x85d   :  { %v852_v4 = vpop.f32.mrf.mxu0 }
 0x863   :  { %v872_v20 = vpop.f32.mrf.mxu2 }
 0x864   :  { %v873_v21 = vadd.f32 %v872_v20, %v852_v4 }
 0x866   :  { %v877_v60 = vadd.f32 %v1053_v11, %v873_v21  ;;  %v885_v15 = vadd.f32 %v883_v63, %v873_v21 }
 0x868   :  { %v878_v22 = vmax.f32 %v877_v60, 0.0  ;;  %946 = vrot.lane.b32.xlu2 %v885_v15, %s1095_s1 }
 0x86a   :  { %1032 = vmatmul.msk.f32.vlgmr.msrb.gmra.mxu3 %vm96_vm3, %v878_v22 }
 0x8c2   :  { %v947_v9 = vpop.permute.xlu2 %946 }
 0x8ed   :  { %v912_v28 = vpop.f32.mrf.mxu3 }
 0x8ee   :  { %v913_v30 = vadd.f32 %v1054_v27, %v912_v28 }
 0x8f0   :  { %v915_v31 = vmax.f32 %v913_v30, 0.0 }
 0x8f2   :  { %1033 = vmatmul.msk.f32.vlgmr.msra.gmra.mxu1 %vm921_vm10, %v915_v31 }
 0x96f   :  { %v942_v33 = vpop.f32.mrf.mxu1 }
 0x970   :  { %v943_v35 = vadd.f32 %v1055_v32, %v942_v33 }
 0x972   :  { %v950_v37 = vsel %vm949_vm11, %v943_v35, %v947_v9 }
 0x973   :  { %v952_v38 = vsel %vm951_vm12, %v950_v37, 0.0 }
 0x974   :  { %v953_v39 = vsel %vm131_vm6, %v952_v38, 0.0 }
 0x975   :  { %954 = vst [vmem:[%s1445_s3] sm:$0xff] %v953_v39 }
 0x976   :  { %959 = vsyncpa [#allocation3], 1 }

</bundles_post_ra>
